<compile_context>
chip_gen: v5e
topology: v5e:2x2
jax: 0.10.0
libtpu: 0.0.40
codegen_flags: <defaults>
</compile_context>

<pallas_src>
import jax
import jax.numpy as jnp
from jax.experimental import pallas as pl
from jax.experimental.pallas import tpu as pltpu


# ---------------------------------------------------------------------------
# Kernel
# ---------------------------------------------------------------------------
def _ensemble_actor_kernel(states_ref, w1_ref, w2_ref, w3_ref, out_ref):
    """Fused ensemble MLP: 3 matmuls total (all actors packed block-diagonally).

    states_ref : [Bblk, S]
    w1_ref     : [S+1,      A*H1]   last row = concatenated layer-1 biases
    w2_ref     : [A*H1 + 1, A*H2]   block-diagonal weights, last row = biases
    w3_ref     : [A*H2 + 1, A*Ad]   block-diagonal weights, last row = biases
    out_ref    : [Bblk, A*Ad]       lane-dense slab; columns [a*Ad:(a+1)*Ad] = actor a
    """
    s = w1_ref.shape[0] - 1          # state_dim
    ah1 = w1_ref.shape[1]            # num_actors * h1
    ah2 = w2_ref.shape[1]            # num_actors * h2

    x = states_ref[...]                                               # [B, S] f32

    # Layer 1 (shared input, lane-concatenated weights) + bias + ReLU.
    h1 = jnp.dot(x, w1_ref[:s, :], preferred_element_type=jnp.float32)
    h1 = jnp.maximum(h1 + w1_ref[s:s + 1, :], 0.0)                    # VPU

    # Layer 2 (block-diagonal: actors stay independent) + bias + ReLU.
    h2 = jnp.dot(h1, w2_ref[:ah1, :], preferred_element_type=jnp.float32)
    h2 = jnp.maximum(h2 + w2_ref[ah1:ah1 + 1, :], 0.0)                # VPU

    # Layer 3 (block-diagonal) + bias + tanh squash; single lane-dense store.
    o = jnp.dot(h2, w3_ref[:ah2, :], preferred_element_type=jnp.float32)
    out_ref[...] = jnp.tanh(o + w3_ref[ah2:ah2 + 1, :])               # tanh on EUP


# ---------------------------------------------------------------------------
# Wrapper
# ---------------------------------------------------------------------------
def ensemble_actor_forward(states, packed, *, batch_block=128, grid_min_batch=256):
    """states: [B, S] f32.  packed: dict from pack_params().

    Returns {'actions': [B, num_actors, action_dim]} — actions[:, a, :] is actor a's
    tanh-squashed output (identical ordering to the original module's per-actor list).
    """
    w1p, w2p, w3p = packed["w1p"], packed["w2p"], packed["w3p"]
    action_dim = packed["action_dim"]
    B, S = states.shape
    out_cols = w3p.shape[1]          # num_actors * action_dim
    out_shape = jax.ShapeDtypeStruct((B, out_cols), jnp.float32)

    if B >= grid_min_batch and B % batch_block == 0:
        # Large batch: 1-D parallel batch grid (uses both TensorCores on v7x).
        # Weight index_maps return a constant block so weights stay VMEM-resident.
        grid = (B // batch_block,)
        out_slab = pl.pallas_call(
            _ensemble_actor_kernel,
            out_shape=out_shape,
            grid=grid,
            in_specs=[
                pl.BlockSpec((batch_block, S), lambda i: (i, 0)),
                pl.BlockSpec(w1p.shape, lambda i: (0, 0)),
                pl.BlockSpec(w2p.shape, lambda i: (0, 0)),
                pl.BlockSpec(w3p.shape, lambda i: (0, 0)),
            ],
            out_specs=pl.BlockSpec((batch_block, out_cols), lambda i: (i, 0)),
            compiler_params=pltpu.CompilerParams(
                dimension_semantics=("parallel",)),
        )(states, w1p, w2p, w3p)
    else:
        # Tiny batch: single invocation, everything (~30 KB) VMEM-resident, no grid overhead.
        vmem = pl.BlockSpec(memory_space=pltpu.MemorySpace.VMEM)
        out_slab = pl.pallas_call(
            _ensemble_actor_kernel,
            out_shape=out_shape,
            in_specs=[vmem] * 4,
            out_specs=vmem,
        )(states, w1p, w2p, w3p)

    # Lane-dense slab; only a cheap reshape (no transpose HLO, per the perf review).
    return {"actions": out_slab.reshape(B, -1, action_dim)}


# ---------------------------------------------------------------------------
# Parameter packing (run ONCE per parameter update, not per forward call)
# ---------------------------------------------------------------------------
def _block_diag(blocks):
    a = len(blocks)
    r, c = blocks[0].shape
    out = jnp.zeros((a * r, a * c), blocks[0].dtype)     # exact zeros off-diagonal
    for i, blk in enumerate(blocks):
        out = out.at[i * r:(i + 1) * r, i * c:(i + 1) * c].set(blk)
    return out


def pack_params(params):
    """Pack per-actor params {w1,b1,w2,b2,w3,b3} (leading actor axis) into three
    bias-augmented slabs for the fused kernel."""
    w1, b1, w2, b2, w3, b3 = (params[k] for k in ("w1", "b1", "w2", "b2", "w3", "b3"))
    A, S, H1 = w1.shape
    H2 = w2.shape[2]
    Ad = w3.shape[2]

    # Layer 1: shared input -> lane-concatenate actors along N; bias = last row.
    w1c = jnp.transpose(w1, (1, 0, 2)).reshape(S, A * H1)
    w1p = jnp.concatenate([w1c, b1.reshape(1, A * H1)], axis=0)          # [S+1, A*H1]

    # Layers 2/3: block-diagonal so actors remain independent; bias = last row.
    w2p = jnp.concatenate(
        [_block_diag([w2[a] for a in range(A)]), b2.reshape(1, A * H2)], axis=0)  # [A*H1+1, A*H2]
    w3p = jnp.concatenate(
        [_block_diag([w3[a] for a in range(A)]), b3.reshape(1, A * Ad)], axis=0)  # [A*H2+1, A*Ad]

    return {"w1p": w1p, "w2p": w2p, "w3p": w3p,
            "num_actors": A, "action_dim": Ad}


def init_params(key, num_actors, state_dim, hidden_dims, action_dim):
    """Deterministic synthetic per-actor parameters, stacked on a leading actor axis."""
    h1, h2 = hidden_dims
    keys = jax.random.split(key, 6)
    scale = 0.1
    w1 = scale * jax.random.normal(keys[0], (num_actors, state_dim, h1), jnp.float32)
    b1 = scale * jax.random.normal(keys[1], (num_actors, 1, h1), jnp.float32)
    w2 = scale * jax.random.normal(keys[2], (num_actors, h1, h2), jnp.float32)
    b2 = scale * jax.random.normal(keys[3], (num_actors, 1, h2), jnp.float32)
    w3 = scale * jax.random.normal(keys[4], (num_actors, h2, action_dim), jnp.float32)
    b3 = scale * jax.random.normal(keys[5], (num_actors, 1, action_dim), jnp.float32)
    return {"w1": w1, "b1": b1, "w2": w2, "b2": b2, "w3": w3, "b3": b3}


def _reference_forward(states, params):
    """Pure-JAX per-actor reference of the same MLP + tanh (correctness oracle)."""
    outs = []
    for i in range(params["w1"].shape[0]):
        h = jnp.maximum(states @ params["w1"][i] + params["b1"][i], 0.0)
        h = jnp.maximum(h @ params["w2"][i] + params["b2"][i], 0.0)
        outs.append(jnp.tanh(h @ params["w3"][i] + params["b3"][i]))
    return outs


# ---------------------------------------------------------------------------
# Self-test
# ---------------------------------------------------------------------------
if __name__ == "__main__":
    # Shapes consistent with the module: state_dim=32, hidden=[32, 32] (network_params =
    # [("relu", 32), ("relu", 32)]), action_dim=8, num_actors=3.
    num_actors = 3
    state_dim = 32
    hidden_dims = [32, 32]
    action_dim = 8

    key = jax.random.PRNGKey(0)
    pkey, skey_small, skey_big = jax.random.split(key, 3)
    params = init_params(pkey, num_actors, state_dim, hidden_dims, action_dim)
    packed = pack_params(params)          # built once, reused for every forward call

    # --- Tiny batch: single no-grid invocation --------------------------------------
    batch = 8
    states = jax.random.normal(skey_small, (batch, state_dim), jnp.float32)
    actions = jax.block_until_ready(
        ensemble_actor_forward(states, packed)["actions"])           # [B, A, Ad]
    assert actions.shape == (batch, num_actors, action_dim)
    refs = _reference_forward(states, params)
    for a, r in enumerate(refs):
        assert float(jnp.max(jnp.abs(actions[:, a, :] - r))) < 1e-5

    # --- Larger batch: parallel batch grid (both TensorCores on v7x) ----------------
    big_batch = 512
    states_big = jax.random.normal(skey_big, (big_batch, state_dim), jnp.float32)
    actions_big = jax.block_until_ready(
        ensemble_actor_forward(states_big, packed)["actions"])       # [B, A, Ad]
    assert actions_big.shape == (big_batch, num_actors, action_dim)
    refs_big = _reference_forward(states_big, params)
    for a, r in enumerate(refs_big):
        assert float(jnp.max(jnp.abs(actions_big[:, a, :] - r))) < 1e-5

    print("KERNEL_OK")
</pallas_src>

<mosaic_0001>
module attributes {stable_mosaic.version = 11 : i64} {
  func.func @_ensemble_actor_kernel(%arg0: memref<8x32xf32, #tpu.memory_space<vmem>>, %arg1: memref<33x96xf32, #tpu.memory_space<vmem>>, %arg2: memref<97x96xf32, #tpu.memory_space<vmem>>, %arg3: memref<97x24xf32, #tpu.memory_space<vmem>>, %arg4: memref<8x24xf32, #tpu.memory_space<vmem>>) attributes {dimension_semantics = [], scalar_prefetch = 0 : i64, scratch_operands = 0 : i64, tpu.core_type = #tpu.core_type<tc>} {
    %c0 = arith.constant 0 : index
    %c0_0 = arith.constant 0 : index
    %0 = vector.load %arg0[%c0, %c0_0] : memref<8x32xf32, #tpu.memory_space<vmem>>, vector<8x32xf32>
    %c0_1 = arith.constant 0 : index
    %c0_2 = arith.constant 0 : index
    %1 = vector.load %arg1[%c0_1, %c0_2] : memref<33x96xf32, #tpu.memory_space<vmem>>, vector<32x96xf32>
    %cst = arith.constant dense<0.000000e+00> : vector<8x96xf32>
    %2 = tpu.matmul %0, %1, %cst {dimension_numbers = #tpu.dot_dimension_numbers<[1], [0], [0], [1], [0, 0, 1, 1], [], []>} : vector<8x32xf32>, vector<32x96xf32>, vector<8x96xf32> -> vector<8x96xf32>
    %c32 = arith.constant 32 : index
    %c0_3 = arith.constant 0 : index
    %3 = vector.load %arg1[%c32, %c0_3] : memref<33x96xf32, #tpu.memory_space<vmem>>, vector<1x96xf32>
    %4 = vector.broadcast %3 : vector<1x96xf32> to vector<8x96xf32>
    %5 = arith.addf %2, %4 : vector<8x96xf32>
    %cst_4 = arith.constant 0.000000e+00 : f32
    %6 = vector.broadcast %cst_4 : f32 to vector<8x96xf32>
    %7 = arith.maximumf %5, %6 : vector<8x96xf32>
    %c0_5 = arith.constant 0 : index
    %c0_6 = arith.constant 0 : index
    %8 = vector.load %arg2[%c0_5, %c0_6] : memref<97x96xf32, #tpu.memory_space<vmem>>, vector<96x96xf32>
    %cst_7 = arith.constant dense<0.000000e+00> : vector<8x96xf32>
    %9 = tpu.matmul %7, %8, %cst_7 {dimension_numbers = #tpu.dot_dimension_numbers<[1], [0], [0], [1], [0, 0, 1, 1], [], []>} : vector<8x96xf32>, vector<96x96xf32>, vector<8x96xf32> -> vector<8x96xf32>
    %c96 = arith.constant 96 : index
    %c0_8 = arith.constant 0 : index
    %10 = vector.load %arg2[%c96, %c0_8] : memref<97x96xf32, #tpu.memory_space<vmem>>, vector<1x96xf32>
    %11 = vector.broadcast %10 : vector<1x96xf32> to vector<8x96xf32>
    %12 = arith.addf %9, %11 : vector<8x96xf32>
    %cst_9 = arith.constant 0.000000e+00 : f32
    %13 = vector.broadcast %cst_9 : f32 to vector<8x96xf32>
    %14 = arith.maximumf %12, %13 : vector<8x96xf32>
    %c0_10 = arith.constant 0 : index
    %c0_11 = arith.constant 0 : index
    %15 = vector.load %arg3[%c0_10, %c0_11] : memref<97x24xf32, #tpu.memory_space<vmem>>, vector<96x24xf32>
    %cst_12 = arith.constant dense<0.000000e+00> : vector<8x24xf32>
    %16 = tpu.matmul %14, %15, %cst_12 {dimension_numbers = #tpu.dot_dimension_numbers<[1], [0], [0], [1], [0, 0, 1, 1], [], []>} : vector<8x96xf32>, vector<96x24xf32>, vector<8x24xf32> -> vector<8x24xf32>
    %c96_13 = arith.constant 96 : index
    %c0_14 = arith.constant 0 : index
    %17 = vector.load %arg3[%c96_13, %c0_14] : memref<97x24xf32, #tpu.memory_space<vmem>>, vector<1x24xf32>
    %18 = vector.broadcast %17 : vector<1x24xf32> to vector<8x24xf32>
    %19 = arith.addf %16, %18 : vector<8x24xf32>
    %20 = math.tanh %19 : vector<8x24xf32>
    %c0_15 = arith.constant 0 : index
    %c0_16 = arith.constant 0 : index
    %21 = vector.load %arg4[%c0_15, %c0_16] : memref<8x24xf32, #tpu.memory_space<vmem>>, vector<8x24xf32>
    tpu.vector_store %arg4[%c0_15, %c0_16], %20 {strides = array<i32>} : memref<8x24xf32, #tpu.memory_space<vmem>>, vector<8x24xf32>,
    return
  }
}

</mosaic_0001>

<bundles_post_ra>
// kernel: tpu_custom_call.1
= control target key start
LH: loop header
LB: loop body
LE: loop exit
PB: predicated region body
PF: predicated region fallthrough
CT: control target
= control target key end

     0   :  { %vm25_vm0 = vcmask 261120   ;;  %s305_s0 = inlined_call_operand.vmem [shape: f32[8,32], index: 0, kind: input, shape index: {}]   ;;  %s306_s1 = inlined_call_operand.vmem [shape: f32[33,96], index: 1, kind: input, shape index: {}]   ;;  %s307_s2 = inlined_call_operand.vmem [shape: f32[97,96], index: 2, kind: input, shape index: {}]   ;;  %s308_s3 = inlined_call_operand.vmem [shape: f32[97,24], index: 3, kind: input, shape index: {}]   ;;  %s309_s4 = inlined_call_operand.hbm [shape: f32[8,24], index: 4, kind: output, shape index: {}]  }
   0x1   :  { %v22_v0 = vld [vmem:[%s306_s1 + $0x18] sm:$0xff]  ;;  %v21_v1 = vld [vmem:[%s306_s1 + $0x10] sm:$0xff]  ;;  %v20_v3 = vld [vmem:[%s306_s1 + $0x8] sm:$0xff] }
   0x2   :  { %41 = vmatpush.msra.mxu0 %v22_v0  ;;  %v61_v2 = vld [vmem:[%s307_s2 + $0x58] sm:$0xff]  ;;  %v60_v4 = vld [vmem:[%s307_s2 + $0x50] sm:$0xff]  ;;  %v59_v5 = vld [vmem:[%s307_s2 + $0x48] sm:$0xff] }
   0x3   :  { %72 = vmatpush.msra.mxu1 %v61_v2  ;;  %v19_v6 = vld [vmem:[%s306_s1] sm:$0xff] }
   0x4   :  { %42 = vmatpush.msra.mxu0 %v21_v1  ;;  %v18_v7 = vld [vmem:[%s305_s0] sm:$0xff] }
   0x5   :  { %73 = vmatpush.msra.mxu1 %v60_v4  ;;  %v58_v8 = vld [vmem:[%s307_s2 + $0x40] sm:$0xff] }
   0x6   :  { %43 = vmatpush.msra.mxu0 %v20_v3 }
   0x7   :  { %74 = vmatpush.msra.mxu1 %v59_v5 }
   0x8   :  { %9 = vsyncpa [#allocation3], 0  ;;  %44 = vmatpush.msra.mxu0 %v19_v6  ;;  %v57_v9 = vld [vmem:[%s307_s2 + $0x38] sm:$0xff]  ;;  %v56_v10 = vld [vmem:[%s307_s2 + $0x30] sm:$0xff]  ;;  %vm64_vm1 = vcmask 785408   ;;  %s180_s24 = smov [#allocation2]  }
   0x9   :  { %145 = vmatmul.msk.f32.vlgmr.msra.gmra.mxu0 %vm25_vm0, %v18_v7  ;;  %75 = vmatpush.msra.mxu1 %v58_v8  ;;  %v55_v11 = vld [vmem:[%s307_s2 + $0x28] sm:$0xff]  ;;  %v54_v12 = vld [vmem:[%s307_s2 + $0x20] sm:$0xff]  ;;  %v53_v13 = vld [vmem:[%s307_s2 + $0x18] sm:$0xff]  ;;  %s134_s25 = sshll.u32 %s180_s24, 4  ;;  %s136_s28 = sshll.u32 %s309_s4, 4  ;;  %vm127_vm2 = vcmask 195584   ;;  %s135_s25 = int_to_ptr.vmem [resolvable:$true] %s134_s25  ;;  %s137_s28 = int_to_ptr.hbm [resolvable:$true] %s136_s28 }
   0xa   :  { %v52_v14 = vld [vmem:[%s307_s2 + $0x10] sm:$0xff]  ;;  %v51_v15 = vld [vmem:[%s307_s2 + $0x8] sm:$0xff]  ;;  %v50_v16 = vld [vmem:[%s307_s2] sm:$0xff] }
   0xb   :  { %76 = vmatpush.msra.mxu1 %v57_v9  ;;  %v100_v17 = vld [vmem:[%s308_s3 + $0x58] sm:$0xff]  ;;  %v99_v18 = vld [vmem:[%s308_s3 + $0x50] sm:$0xff]  ;;  %v98_v19 = vld [vmem:[%s308_s3 + $0x48] sm:$0xff] }
   0xc   :  { %110 = vmatpush.msra.mxu2 %v100_v17  ;;  %v97_v20 = vld [vmem:[%s308_s3 + $0x40] sm:$0xff]  ;;  %v96_v21 = vld [vmem:[%s308_s3 + $0x38] sm:$0xff]  ;;  %v95_v22 = vld [vmem:[%s308_s3 + $0x30] sm:$0xff] }
   0xd   :  { %77 = vmatpush.msra.mxu1 %v56_v10  ;;  %v94_v23 = vld [vmem:[%s308_s3 + $0x28] sm:$0xff]  ;;  %v93_v24 = vld [vmem:[%s308_s3 + $0x20] sm:$0xff]  ;;  %v92_v25 = vld [vmem:[%s308_s3 + $0x18] sm:$0xff] }
   0xe   :  { %111 = vmatpush.msra.mxu2 %v99_v18  ;;  %v149_v26 = vld [vmem:[%s306_s1 + $0x20] ss:$0 sm:$0xff]  ;;  %v91_v30 = vld [vmem:[%s308_s3 + $0x10] sm:$0xff]  ;;  %v90_v31 = vld [vmem:[%s308_s3 + $0x8] sm:$0xff] }
   0xf   :  { %78 = vmatpush.msra.mxu1 %v55_v11  ;;  %v89_v32 = vld [vmem:[%s308_s3] sm:$0xff] }
  0x10   :  { %112 = vmatpush.msra.mxu2 %v98_v19  ;;  %v150_v33 = vld [vmem:[%s307_s2 + $0x60] ss:$0 sm:$0xff] }
  0x11   :  { %79 = vmatpush.msra.mxu1 %v54_v12  ;;  %v151_v37 = vld [vmem:[%s308_s3 + $0x60] ss:$0 sm:$0xff] }
  0x12   :  { %113 = vmatpush.msra.mxu2 %v97_v20 }
  0x13   :  { %80 = vmatpush.msra.mxu1 %v53_v13 }
  0x14   :  { %114 = vmatpush.msra.mxu2 %v96_v21 }
  0x15   :  { %81 = vmatpush.msra.mxu1 %v52_v14 }
  0x16   :  { %115 = vmatpush.msra.mxu2 %v95_v22 }
  0x17   :  { %82 = vmatpush.msra.mxu1 %v51_v15 }
  0x18   :  { %116 = vmatpush.msra.mxu2 %v94_v23 }
  0x19   :  { %83 = vmatpush.msra.mxu1 %v50_v16 }
  0x1a   :  { %117 = vmatpush.msra.mxu2 %v93_v24 }
  0x1c   :  { %118 = vmatpush.msra.mxu2 %v92_v25 }
  0x1e   :  { %119 = vmatpush.msra.mxu2 %v91_v30 }
  0x20   :  { %120 = vmatpush.msra.mxu2 %v90_v31 }
  0x22   :  { %121 = vmatpush.msra.mxu2 %v89_v32 }
  0x86   :  { %v46_v27 = vpop.f32.mrf.mxu0 }
  0x87   :  { %v47_v28 = vadd.f32 %v149_v26, %v46_v27 }
  0x89   :  { %v49_v29 = vmax.f32 %v47_v28, 0.0 }
  0x8b   :  { %146 = vmatmul.msk.f32.vlgmr.msra.gmra.mxu1 %vm64_vm1, %v49_v29 }
 0x108   :  { %v85_v34 = vpop.f32.mrf.mxu1 }
 0x109   :  { %v86_v35 = vadd.f32 %v150_v33, %v85_v34 }
 0x10b   :  { %v88_v36 = vmax.f32 %v86_v35, 0.0 }
 0x10d   :  { %147 = vmatmul.msk.f32.vlgmr.msra.gmra.mxu2 %vm64_vm1, %v88_v36 }
 0x190   :  { %v123_v38 = vpop.f32.mrf.mxu2 }
 0x191   :  { %v124_v39 = vadd.f32 %v151_v37, %v123_v38 }
 0x193   :  { %152 = vtanh.f32 %v124_v39 }
 0x199   :  { %v153_v40 = vpop.eup %152 }
 0x19a   :  { %128 = vst.msk [vmem:[#allocation2] sm:$0xff] %vm127_vm2, %v153_v40 }
 0x19b   :  { %139 = dma.vmem_to_hbm [thread:$0]  %s135_s25, 128, %s137_s28, [#allocation3]  }
 0x19c   :  { %178 = dma.done.wait [#allocation3], 128  }
 0x19d   :  { %179 = vsyncadd [#allocation3], 4294967168 }
 0x19e   :  { %144 = vsyncpa [#allocation3], 1 }

</bundles_post_ra>
